<compile_context>
chip_gen: v5e
topology: v5e:2x2
jax: 0.10.0
libtpu: 0.0.40
codegen_flags: <defaults>
</compile_context>

<pallas_src>
import functools

import jax
import jax.numpy as jnp
from jax.experimental import pallas as pl
from jax.experimental.pallas import tpu as pltpu

_LANE = 128          # vreg lane width (last dim)
_SUBLANE_BF16 = 16   # bf16 packs 16 rows per vreg sublane block


def _round_up(x, m):
    return ((x + m - 1) // m) * m


def _physical_vmem_bytes():
    """Generation-aware physical VMEM (v5e/v6e: 128 MiB, v7x: 64 MiB)."""
    try:
        return int(pltpu.get_tpu_info().vmem_capacity_bytes)
    except Exception:
        return 64 * 2**20    # conservative (v7x-sized) fallback


def _mlp_kernel(x_ref, *refs, n_hidden):
    """Fused MLP forward (eval-mode dropout == identity, omitted).

    dots: bf16 operands + f32 MXU accumulation.  bias add / ReLU: f32
    (v5e VPU has no bf16).
    """
    if n_hidden > 0:
        (w_in_ref, b_in_ref, w_hid_ref, b_hid_ref,
         w_out_ref, b_out_ref, o_ref) = refs
    else:
        w_in_ref, b_in_ref, w_out_ref, b_out_ref, o_ref = refs
        w_hid_ref = b_hid_ref = None

    # Input layer + ReLU.  x arrives already in bf16 (no in-kernel cast).
    h = jnp.dot(x_ref[...], w_in_ref[...],
                preferred_element_type=jnp.float32) + b_in_ref[...]
    h = jnp.maximum(h, 0.0)

    # Hidden layers: depth is a small compile-time constant -> unrolled.
    # TODO(synk): switch to lax.fori_loop with dynamic w_hid_ref[i] indexing
    # if mlp_depth / mlp_width grow enough to cause vreg spills.
    for i in range(n_hidden):
        h = jnp.dot(h.astype(jnp.bfloat16), w_hid_ref[i],
                    preferred_element_type=jnp.float32) + b_hid_ref[i]
        h = jnp.maximum(h, 0.0)

    # Output layer (no activation).  n_out is lane-padded -> unmasked store.
    o_ref[...] = (jnp.dot(h.astype(jnp.bfloat16), w_out_ref[...],
                          preferred_element_type=jnp.float32)
                  + b_out_ref[...]).astype(o_ref.dtype)


def mlp_forward(x, params, *, tile_b=None, out_dtype=jnp.float32,
                vmem_budget_bytes=None):
    """Run the fused MLP Pallas kernel.

    params: dict with
      w_in  (n_inputs, width)          b_in  (1, width)
      w_hid (n_hidden, width, width)   b_hid (n_hidden, 1, width)
      w_out (width, n_outputs)         b_out (1, n_outputs)
    (weights already transposed relative to PyTorch's (out, in) layout)
    """
    B, n_inputs = x.shape
    width = params["w_in"].shape[1]
    n_outputs = params["w_out"].shape[1]
    n_hidden = params["w_hid"].shape[0]

    # ---- feature-dim padding -----------------------------------------------
    # x keeps its real feature width (block dim == full array dim is legal);
    # only weight output sides are lane-padded so every dot N-dim and the
    # final store are lane-dense.  Width uses 256-multiples past 128 so the
    # 256x256 MXUs (v6e/v7x) stay full when the matmuls start to matter.
    width_mult = 256 if width > 128 else _LANE
    width_p = _round_up(max(width, 1), width_mult)
    n_out_p = _round_up(max(n_outputs, 1), _LANE)

    def pad2(a, r, c):
        return jnp.pad(a, ((0, r - a.shape[0]), (0, c - a.shape[1])))

    w_in = pad2(params["w_in"], n_inputs, width_p).astype(jnp.bfloat16)
    b_in = pad2(params["b_in"], 1, width_p).astype(jnp.float32)
    w_out = pad2(params["w_out"], width_p, n_out_p).astype(jnp.bfloat16)
    b_out = pad2(params["b_out"], 1, n_out_p).astype(jnp.float32)
    if n_hidden > 0:
        w_hid = jnp.pad(
            params["w_hid"],
            ((0, 0), (0, width_p - width), (0, width_p - width)),
        ).astype(jnp.bfloat16)
        b_hid = jnp.pad(
            params["b_hid"], ((0, 0), (0, 0), (0, width_p - width)),
        ).astype(jnp.float32)

    # ---- VMEM accounting (generation-aware) --------------------------------
    out_itemsize = jnp.dtype(out_dtype).itemsize
    static_bytes = (2 * (n_inputs * width_p + n_hidden * width_p * width_p
                         + width_p * n_out_p)                 # bf16 weights
                    + 4 * (width_p * (1 + n_hidden) + n_out_p))  # f32 biases
    # Per batch-row: double-buffered bf16 x tile, double-buffered out tile,
    # and live activation temporaries (f32 h, bf16 copy, per-layer dot result).
    per_row_bytes = (2 * 2 * n_inputs               # x (bf16) x 2 buffers
                     + 2 * out_itemsize * n_out_p   # out tile x 2 buffers
                     + 3 * 4 * width_p + 2 * width_p)  # in-kernel temporaries
    headroom = 2 * 2**20

    phys = _physical_vmem_bytes()
    if vmem_budget_bytes is None:
        vmem_budget_bytes = (phys * 3) // 4

    # ---- batch-tile selection (balanced, 16-row granularity) ---------------
    if tile_b is None:
        cap = 2048
        num_tiles = max(1, pl.cdiv(B, cap))
        if B >= 256:
            # v7x has 2 TensorCores; the grid axis is what gets sharded across
            # them, so make sure both get a step (harmless on v5e/v6e).
            num_tiles = max(num_tiles, 2)
        tile_b = _round_up(pl.cdiv(B, num_tiles), _SUBLANE_BF16)
        avail = max(vmem_budget_bytes - static_bytes - headroom,
                    per_row_bytes * _SUBLANE_BF16)
        tile_b_vmem = max(
            _SUBLANE_BF16,
            ((avail // per_row_bytes) // _SUBLANE_BF16) * _SUBLANE_BF16)
        tile_b = min(tile_b, tile_b_vmem, cap)
    tile_b = max(_SUBLANE_BF16, (tile_b // _SUBLANE_BF16) * _SUBLANE_BF16)
    # Rebalance so padding rows are minimal (avoid B=520 -> B_p=1024 cases).
    num_tiles = pl.cdiv(B, tile_b)
    tile_b = _round_up(pl.cdiv(B, num_tiles), _SUBLANE_BF16)
    B_p = num_tiles * tile_b

    vmem_limit = int(min(
        max(static_bytes + per_row_bytes * tile_b + headroom, 8 * 2**20),
        phys))

    # x: batch-pad only, streamed in bf16 at its real feature width.
    x_p = jnp.pad(x, ((0, B_p - B), (0, 0))).astype(jnp.bfloat16)

    # Grid-invariant parameters: whole-array VMEM residency, no pipelining,
    # no double-buffering.
    def vmem_spec():
        return pl.BlockSpec(memory_space=pltpu.MemorySpace.VMEM)

    in_specs = [pl.BlockSpec((tile_b, n_inputs), lambda i: (i, 0)),
                vmem_spec(), vmem_spec()]
    args = [x_p, w_in, b_in]
    if n_hidden > 0:
        in_specs += [vmem_spec(), vmem_spec()]
        args += [w_hid, b_hid]
    in_specs += [vmem_spec(), vmem_spec()]
    args += [w_out, b_out]

    kernel = functools.partial(_mlp_kernel, n_hidden=n_hidden)

    out_p = pl.pallas_call(
        kernel,
        out_shape=jax.ShapeDtypeStruct((B_p, n_out_p), out_dtype),
        grid_spec=pltpu.PrefetchScalarGridSpec(
            num_scalar_prefetch=0,
            grid=(num_tiles,),
            in_specs=in_specs,
            out_specs=pl.BlockSpec((tile_b, n_out_p), lambda i: (i, 0)),
        ),
        compiler_params=pltpu.CompilerParams(
            dimension_semantics=("parallel",),
            vmem_limit_bytes=vmem_limit,
        ),
    )(*args)

    return out_p[:B, :n_outputs]


def init_mlp_params(key, n_inputs, n_outputs, mlp_width, mlp_depth):
    """Deterministic synthetic parameters (shapes match nn.Linear layers)."""
    n_hidden = mlp_depth - 2
    keys = jax.random.split(key, 2 * (n_hidden + 2))
    ki = iter(keys)

    def linear(k_w, k_b, fan_in, fan_out):
        # PyTorch Linear weight is (out, in); transpose to (in, out).
        bound = 1.0 / jnp.sqrt(fan_in)
        w = jax.random.uniform(k_w, (fan_out, fan_in), jnp.float32,
                               -bound, bound).T
        b = jax.random.uniform(k_b, (1, fan_out), jnp.float32, -bound, bound)
        return w, b

    w_in, b_in = linear(next(ki), next(ki), n_inputs, mlp_width)

    w_hid_list, b_hid_list = [], []
    for _ in range(n_hidden):
        w, b = linear(next(ki), next(ki), mlp_width, mlp_width)
        w_hid_list.append(w)
        b_hid_list.append(b)
    if n_hidden > 0:
        w_hid = jnp.stack(w_hid_list)                       # (n_hidden, W, W)
        b_hid = jnp.stack(b_hid_list)                       # (n_hidden, 1, W)
    else:
        w_hid = jnp.zeros((0, mlp_width, mlp_width), jnp.float32)
        b_hid = jnp.zeros((0, 1, mlp_width), jnp.float32)

    w_out, b_out = linear(next(ki), next(ki), mlp_width, n_outputs)

    return {"w_in": w_in, "b_in": b_in,
            "w_hid": w_hid, "b_hid": b_hid,
            "w_out": w_out, "b_out": b_out}


def mlp_reference(x, params, *, use_bf16=True):
    """Pure-JAX reference (eval-mode forward), mirroring the kernel's
    bf16-operand / f32-accumulation mixed precision."""
    cast = (lambda a: a.astype(jnp.bfloat16)) if use_bf16 else (lambda a: a)
    h = jnp.dot(cast(x), cast(params["w_in"]),
                preferred_element_type=jnp.float32) + params["b_in"]
    h = jnp.maximum(h, 0.0)
    for i in range(params["w_hid"].shape[0]):
        h = jnp.dot(cast(h), cast(params["w_hid"][i]),
                    preferred_element_type=jnp.float32) + params["b_hid"][i]
        h = jnp.maximum(h, 0.0)
    return jnp.dot(cast(h), cast(params["w_out"]),
                   preferred_element_type=jnp.float32) + params["b_out"]


if __name__ == "__main__":
    # hparams: mlp_width=32, mlp_depth=4 (-> 2 hidden layers), mlp_dropout=0.0
    batch, n_inputs, n_outputs, mlp_width, mlp_depth = 8, 16, 8, 32, 4

    key = jax.random.PRNGKey(0)
    k_x, k_p, k_p2 = jax.random.split(key, 3)
    x = jax.random.normal(k_x, (batch, n_inputs), jnp.float32)
    params = init_mlp_params(k_p, n_inputs, n_outputs, mlp_width, mlp_depth)

    out = mlp_forward(x, params)
    out = jax.block_until_ready(out)
    ref = mlp_reference(x, params)
    assert out.shape == (batch, n_outputs)
    assert jnp.allclose(out, ref, atol=1e-3, rtol=1e-3), (
        float(jnp.max(jnp.abs(out - ref))))

    # depth == 2 (no hidden layers) path: wrapper drops the hidden operands.
    params2 = init_mlp_params(k_p2, n_inputs, n_outputs, mlp_width, 2)
    out2 = jax.block_until_ready(mlp_forward(x, params2))
    ref2 = mlp_reference(x, params2)
    assert jnp.allclose(out2, ref2, atol=1e-3, rtol=1e-3)

    print("KERNEL_OK")
</pallas_src>

<mosaic_0001>
module attributes {stable_mosaic.version = 11 : i64} {
  func.func @_mlp_kernel(%arg0: i32, %arg1: memref<16x16xbf16, #tpu.memory_space<vmem>>, %arg2: memref<16x128xbf16, #tpu.memory_space<vmem>>, %arg3: memref<1x128xf32, #tpu.memory_space<vmem>>, %arg4: memref<2x128x128xbf16, #tpu.memory_space<vmem>>, %arg5: memref<2x1x128xf32, #tpu.memory_space<vmem>>, %arg6: memref<128x128xbf16, #tpu.memory_space<vmem>>, %arg7: memref<1x128xf32, #tpu.memory_space<vmem>>, %arg8: memref<16x128xf32, #tpu.memory_space<vmem>>) attributes {dimension_semantics = [#tpu.dimension_semantics<parallel>], iteration_bounds = array<i64: 1>, scalar_prefetch = 0 : i64, scratch_operands = 0 : i64, tpu.core_type = #tpu.core_type<tc>, window_params = [{transform_indices = @transform_0, window_bounds = array<i64: 16, 16>}, {pipeline_mode = #tpu.pipeline_mode<synchronous>, transform_indices = @transform_1, window_bounds = array<i64: 16, 128>}, {pipeline_mode = #tpu.pipeline_mode<synchronous>, transform_indices = @transform_2, window_bounds = array<i64: 1, 128>}, {pipeline_mode = #tpu.pipeline_mode<synchronous>, transform_indices = @transform_3, window_bounds = array<i64: 2, 128, 128>}, {pipeline_mode = #tpu.pipeline_mode<synchronous>, transform_indices = @transform_4, window_bounds = array<i64: 2, 1, 128>}, {pipeline_mode = #tpu.pipeline_mode<synchronous>, transform_indices = @transform_5, window_bounds = array<i64: 128, 128>}, {pipeline_mode = #tpu.pipeline_mode<synchronous>, transform_indices = @transform_6, window_bounds = array<i64: 1, 128>}, {transform_indices = @transform_7, window_bounds = array<i64: 16, 128>}]} {
    %c0 = arith.constant 0 : index
    %c0_0 = arith.constant 0 : index
    %0 = vector.load %arg1[%c0, %c0_0] : memref<16x16xbf16, #tpu.memory_space<vmem>>, vector<16x16xbf16>
    %c0_1 = arith.constant 0 : index
    %c0_2 = arith.constant 0 : index
    %1 = vector.load %arg2[%c0_1, %c0_2] : memref<16x128xbf16, #tpu.memory_space<vmem>>, vector<16x128xbf16>
    %cst = arith.constant dense<0.000000e+00> : vector<16x128xf32>
    %2 = tpu.matmul %0, %1, %cst {dimension_numbers = #tpu.dot_dimension_numbers<[1], [0], [0], [1], [0, 0, 1, 1], [], []>} : vector<16x16xbf16>, vector<16x128xbf16>, vector<16x128xf32> -> vector<16x128xf32>
    %c0_3 = arith.constant 0 : index
    %c0_4 = arith.constant 0 : index
    %3 = vector.load %arg3[%c0_3, %c0_4] : memref<1x128xf32, #tpu.memory_space<vmem>>, vector<1x128xf32>
    %4 = vector.broadcast %3 : vector<1x128xf32> to vector<16x128xf32>
    %5 = arith.addf %2, %4 : vector<16x128xf32>
    %cst_5 = arith.constant 0.000000e+00 : f32
    %6 = vector.broadcast %cst_5 : f32 to vector<16x128xf32>
    %7 = arith.maximumf %5, %6 : vector<16x128xf32>
    %8 = arith.truncf %7 : vector<16x128xf32> to vector<16x128xbf16>
    %c0_6 = arith.constant 0 : index
    %c0_7 = arith.constant 0 : index
    %c0_8 = arith.constant 0 : index
    %9 = vector.load %arg4[%c0_6, %c0_7, %c0_8] : memref<2x128x128xbf16, #tpu.memory_space<vmem>>, vector<1x128x128xbf16>
    %10 = vector.shape_cast %9 : vector<1x128x128xbf16> to vector<128x128xbf16>
    %cst_9 = arith.constant dense<0.000000e+00> : vector<16x128xf32>
    %11 = tpu.matmul %8, %10, %cst_9 {dimension_numbers = #tpu.dot_dimension_numbers<[1], [0], [0], [1], [0, 0, 1, 1], [], []>} : vector<16x128xbf16>, vector<128x128xbf16>, vector<16x128xf32> -> vector<16x128xf32>
    %c0_10 = arith.constant 0 : index
    %c0_11 = arith.constant 0 : index
    %c0_12 = arith.constant 0 : index
    %12 = vector.load %arg5[%c0_10, %c0_11, %c0_12] : memref<2x1x128xf32, #tpu.memory_space<vmem>>, vector<1x1x128xf32>
    %13 = vector.shape_cast %12 : vector<1x1x128xf32> to vector<1x128xf32>
    %14 = vector.broadcast %13 : vector<1x128xf32> to vector<16x128xf32>
    %15 = arith.addf %11, %14 : vector<16x128xf32>
    %cst_13 = arith.constant 0.000000e+00 : f32
    %16 = vector.broadcast %cst_13 : f32 to vector<16x128xf32>
    %17 = arith.maximumf %15, %16 : vector<16x128xf32>
    %18 = arith.truncf %17 : vector<16x128xf32> to vector<16x128xbf16>
    %c1 = arith.constant 1 : index
    %c0_14 = arith.constant 0 : index
    %c0_15 = arith.constant 0 : index
    %19 = vector.load %arg4[%c1, %c0_14, %c0_15] : memref<2x128x128xbf16, #tpu.memory_space<vmem>>, vector<1x128x128xbf16>
    %20 = vector.shape_cast %19 : vector<1x128x128xbf16> to vector<128x128xbf16>
    %cst_16 = arith.constant dense<0.000000e+00> : vector<16x128xf32>
    %21 = tpu.matmul %18, %20, %cst_16 {dimension_numbers = #tpu.dot_dimension_numbers<[1], [0], [0], [1], [0, 0, 1, 1], [], []>} : vector<16x128xbf16>, vector<128x128xbf16>, vector<16x128xf32> -> vector<16x128xf32>
    %c1_17 = arith.constant 1 : index
    %c0_18 = arith.constant 0 : index
    %c0_19 = arith.constant 0 : index
    %22 = vector.load %arg5[%c1_17, %c0_18, %c0_19] : memref<2x1x128xf32, #tpu.memory_space<vmem>>, vector<1x1x128xf32>
    %23 = vector.shape_cast %22 : vector<1x1x128xf32> to vector<1x128xf32>
    %24 = vector.broadcast %23 : vector<1x128xf32> to vector<16x128xf32>
    %25 = arith.addf %21, %24 : vector<16x128xf32>
    %cst_20 = arith.constant 0.000000e+00 : f32
    %26 = vector.broadcast %cst_20 : f32 to vector<16x128xf32>
    %27 = arith.maximumf %25, %26 : vector<16x128xf32>
    %28 = arith.truncf %27 : vector<16x128xf32> to vector<16x128xbf16>
    %c0_21 = arith.constant 0 : index
    %c0_22 = arith.constant 0 : index
    %29 = vector.load %arg6[%c0_21, %c0_22] : memref<128x128xbf16, #tpu.memory_space<vmem>>, vector<128x128xbf16>
    %cst_23 = arith.constant dense<0.000000e+00> : vector<16x128xf32>
    %30 = tpu.matmul %28, %29, %cst_23 {dimension_numbers = #tpu.dot_dimension_numbers<[1], [0], [0], [1], [0, 0, 1, 1], [], []>} : vector<16x128xbf16>, vector<128x128xbf16>, vector<16x128xf32> -> vector<16x128xf32>
    %c0_24 = arith.constant 0 : index
    %c0_25 = arith.constant 0 : index
    %31 = vector.load %arg7[%c0_24, %c0_25] : memref<1x128xf32, #tpu.memory_space<vmem>>, vector<1x128xf32>
    %32 = vector.broadcast %31 : vector<1x128xf32> to vector<16x128xf32>
    %33 = arith.addf %30, %32 : vector<16x128xf32>
    %c0_26 = arith.constant 0 : index
    %c0_27 = arith.constant 0 : index
    %34 = vector.load %arg8[%c0_26, %c0_27] : memref<16x128xf32, #tpu.memory_space<vmem>>, vector<16x128xf32>
    tpu.vector_store %arg8[%c0_26, %c0_27], %33 {strides = array<i32>} : memref<16x128xf32, #tpu.memory_space<vmem>>, vector<16x128xf32>,
    return
  }
  func.func @transform_0(%arg0: i32) -> (i32, i32) {
    %c0_i32 = arith.constant 0 : i32
    %c0_i32_0 = arith.constant 0 : i32
    return %arg0, %c0_i32 : i32, i32
  }
  func.func @transform_1(%arg0: i32) -> (i32, i32) {
    %c0_i32 = arith.constant 0 : i32
    %c0_i32_0 = arith.constant 0 : i32
    %c0_i32_1 = arith.constant 0 : i32
    return %c0_i32, %c0_i32_0 : i32, i32
  }
  func.func @transform_2(%arg0: i32) -> (i32, i32) {
    %c0_i32 = arith.constant 0 : i32
    %c0_i32_0 = arith.constant 0 : i32
    %c0_i32_1 = arith.constant 0 : i32
    return %c0_i32, %c0_i32_0 : i32, i32
  }
  func.func @transform_3(%arg0: i32) -> (i32, i32, i32) {
    %c0_i32 = arith.constant 0 : i32
    %c0_i32_0 = arith.constant 0 : i32
    %c0_i32_1 = arith.constant 0 : i32
    %c0_i32_2 = arith.constant 0 : i32
    return %c0_i32, %c0_i32_0, %c0_i32_1 : i32, i32, i32
  }
  func.func @transform_4(%arg0: i32) -> (i32, i32, i32) {
    %c0_i32 = arith.constant 0 : i32
    %c0_i32_0 = arith.constant 0 : i32
    %c0_i32_1 = arith.constant 0 : i32
    %c0_i32_2 = arith.constant 0 : i32
    return %c0_i32, %c0_i32_0, %c0_i32_1 : i32, i32, i32
  }
  func.func @transform_5(%arg0: i32) -> (i32, i32) {
    %c0_i32 = arith.constant 0 : i32
    %c0_i32_0 = arith.constant 0 : i32
    %c0_i32_1 = arith.constant 0 : i32
    return %c0_i32, %c0_i32_0 : i32, i32
  }
  func.func @transform_6(%arg0: i32) -> (i32, i32) {
    %c0_i32 = arith.constant 0 : i32
    %c0_i32_0 = arith.constant 0 : i32
    %c0_i32_1 = arith.constant 0 : i32
    return %c0_i32, %c0_i32_0 : i32, i32
  }
  func.func @transform_7(%arg0: i32) -> (i32, i32) {
    %c0_i32 = arith.constant 0 : i32
    %c0_i32_0 = arith.constant 0 : i32
    return %arg0, %c0_i32 : i32, i32
  }
}

</mosaic_0001>

<bundles_post_ra>
// kernel: tpu_custom_call.1
= control target key start
LH: loop header
LB: loop body
LE: loop exit
PB: predicated region body
PF: predicated region fallthrough
CT: control target
= control target key end

     0   :  { %12 = vsyncpa [#allocation3], 0  ;;  %s757_s0 = inlined_call_operand.hbm [shape: bf16[16,16], index: 0, kind: input, shape index: {}]   ;;  %s758_s1 = inlined_call_operand.hbm [shape: bf16[16,128], index: 1, kind: input, shape index: {}]   ;;  %s759_s2 = inlined_call_operand.vmem [shape: f32[1,128], index: 2, kind: input, shape index: {}]   ;;  %s760_s3 = inlined_call_operand.hbm [shape: bf16[2,128,128], index: 3, kind: input, shape index: {}]   ;;  %s761_s4 = inlined_call_operand.vmem [shape: f32[2,1,128], index: 4, kind: input, shape index: {}]   ;;  %s762_s5 = inlined_call_operand.hbm [shape: bf16[128,128], index: 5, kind: input, shape index: {}]   ;;  %s763_s6 = inlined_call_operand.vmem [shape: f32[1,128], index: 6, kind: input, shape index: {}]   ;;  %s764_s7 = inlined_call_operand.hbm [shape: f32[16,128], index: 7, kind: output, shape index: {}]  }
   0x1   :  { %13 = vsyncpa [#allocation6], 0 }
   0x2   :  { %14 = vsyncpa [#allocation9], 0 }
   0x3   :  { %15 = vsyncpa [#allocation4], 0  ;;  %s33_s26 = sshll.u32 %s758_s1, 4  ;;  %s681_s27 = smov [#allocation5]   ;;  %s34_s26 = int_to_ptr.hbm [resolvable:$true] %s33_s26 }
   0x4   :  { %s35_s28 = sshll.u32 %s681_s27, 4  ;;  %s20_s8 = sshll.u32 %s757_s0, 4  ;;  %s36_s28 = int_to_ptr.vmem [resolvable:$true] %s35_s28  ;;  %s21_s8 = int_to_ptr.hbm [resolvable:$true] %s20_s8 }
   0x5   :  { %s682_s9 = smov 64   ;;  %s683_s10 = smov 4  }
   0x6   :  { %41 = dma.hbm_to_vmem [thread:$0]  %s34_s26, 128, %s36_s28, [#allocation6], %s682_s9, %s682_s9, %s683_s10  }
   0x7   :  { %s684_s11 = smov [#allocation2]   ;;  %s48_s15 = sshll.u32 %s760_s3, 4  ;;  %s49_s15 = int_to_ptr.hbm [resolvable:$true] %s48_s15 }
   0x8   :  { %s22_s12 = sshll.u32 %s684_s11, 4  ;;  %s63_s17 = sshll.u32 %s762_s5, 4  ;;  %s23_s12 = int_to_ptr.vmem [resolvable:$true] %s22_s12  ;;  %s64_s17 = int_to_ptr.hbm [resolvable:$true] %s63_s17 }
   0x9   :  { %28 = dma.hbm_to_vmem [thread:$0]  %s21_s8, 128, %s23_s12, [#allocation3], %s682_s9, %s682_s9, %s683_s10  }
   0xa   :  { %s685_s18 = smov [#allocation7]   ;;  %s686_s0 = smov [#allocation8]  }
   0xb   :  { %s50_s19 = sshll.u32 %s685_s18, 4  ;;  %s65_s20 = sshll.u32 %s686_s0, 4  ;;  %s51_s19 = int_to_ptr.vmem [resolvable:$true] %s50_s19  ;;  %s66_s20 = int_to_ptr.vmem [resolvable:$true] %s65_s20 }
   0xc   :  { %56 = dma.hbm_to_vmem [thread:$0]  %s49_s15, 2048, %s51_s19, [#allocation6], %s682_s9, %s682_s9, %s683_s10  }
   0xd   :  { %71 = dma.hbm_to_vmem [thread:$0]  %s64_s17, 1024, %s66_s20, [#allocation9], %s682_s9, %s682_s9, %s683_s10  }
   0xe   :  { %673 = dma.done.wait [#allocation3], 128  }
   0xf   :  { %674 = vsyncadd [#allocation3], 4294967168 }
  0x10   :  { %675 = dma.done.wait [#allocation6], 2176  }
  0x11   :  { %676 = vsyncadd [#allocation6], 4294965120 }
  0x12   :  { %677 = dma.done.wait [#allocation9], 1024  }
  0x13   :  { %678 = vsyncadd [#allocation9], 4294966272  ;;  %v515_v0 = vld [vmem:[#allocation5] sm:$0xff]  ;;  %v514_v2 = vld [vmem:[#allocation2] sm:$0xff]  ;;  %vm110_vm0 = vcmask 130048   ;;  %s687_s26 = smov [#allocation10]  }
  0x14   :  { %v523_v1 = vld [vmem:[#allocation7 + $0x38] sm:$0xff]  ;;  %121 = vmatpush.bf16.msra.mxu0 %v515_v0  ;;  %v522_v3 = vld [vmem:[#allocation7 + $0x30] sm:$0xff]  ;;  %v521_v4 = vld [vmem:[#allocation7 + $0x28] sm:$0xff]  ;;  %s391_s27 = sshll.u32 %s687_s26, 4  ;;  %s688_s30 = smov 128   ;;  %s392_s27 = int_to_ptr.vmem [resolvable:$true] %s391_s27 }
  0x15   :  { %199 = vmatpush.bf16.msra.mxu1 %v523_v1  ;;  %v520_v5 = vld [vmem:[#allocation7 + $0x20] sm:$0xff]  ;;  %v519_v6 = vld [vmem:[#allocation7 + $0x18] sm:$0xff]  ;;  %v518_v7 = vld [vmem:[#allocation7 + $0x10] sm:$0xff]  ;;  %s689_s8 = smov 8  }
  0x16   :  { %v517_v8 = vld [vmem:[#allocation7 + $0x8] sm:$0xff]  ;;  %v516_v9 = vld [vmem:[#allocation7] sm:$0xff]  ;;  %v531_v10 = vld [vmem:[#allocation7 + $0x78] sm:$0xff] }
  0x17   :  { %416 = vmatmul.msk.bf16.vlgmr.msra.gmra.mxu0 %vm110_vm0, %v514_v2  ;;  %286 = vmatpush.bf16.msra.mxu2 %v531_v10  ;;  %v530_v11 = vld [vmem:[#allocation7 + $0x70] sm:$0xff]  ;;  %v529_v12 = vld [vmem:[#allocation7 + $0x68] sm:$0xff]  ;;  %v528_v13 = vld [vmem:[#allocation7 + $0x60] sm:$0xff] }
  0x18   :  { %v549_v15 = vld [vmem:[%s759_s2] ss:$0 sm:$0xff]  ;;  %v527_v22 = vld [vmem:[#allocation7 + $0x58] sm:$0xff]  ;;  %v525_v24 = vld [vmem:[#allocation7 + $0x48] sm:$0xff] }
  0x19   :  { %200 = vmatpush.bf16.msra.mxu1 %v522_v3  ;;  %v526_v23 = vld [vmem:[#allocation7 + $0x50] sm:$0xff]  ;;  %v524_v25 = vld [vmem:[#allocation7 + $0x40] sm:$0xff]  ;;  %v539_v26 = vld [vmem:[#allocation8 + $0x38] sm:$0xff] }
  0x1a   :  { %371 = vmatpush.bf16.msra.mxu3 %v539_v26  ;;  %v538_v27 = vld [vmem:[#allocation8 + $0x30] sm:$0xff]  ;;  %v537_v28 = vld [vmem:[#allocation8 + $0x28] sm:$0xff]  ;;  %v536_v29 = vld [vmem:[#allocation8 + $0x20] sm:$0xff] }
  0x1b   :  { %287 = vmatpush.bf16.msra.mxu2 %v530_v11  ;;  %v550_v31 = vld [vmem:[%s761_s4] ss:$0 sm:$0xff]  ;;  %v535_v38 = vld [vmem:[#allocation8 + $0x18] sm:$0xff]  ;;  %v533_v40 = vld [vmem:[#allocation8 + $0x8] sm:$0xff] }
  0x1c   :  { %v534_v39 = vld [vmem:[#allocation8 + $0x10] sm:$0xff]  ;;  %v532_v41 = vld [vmem:[#allocation8] sm:$0xff] }
  0x1d   :  { %201 = vmatpush.bf16.msra.mxu1 %v521_v4  ;;  %v551_v43 = vld [vmem:[%s761_s4 + $0x1] ss:$0 sm:$0xff]  ;;  %v552_v50 = vld [vmem:[%s763_s6] ss:$0 sm:$0xff]  ;;  %s393_s4 = sshll.u32 %s764_s7, 4  ;;  %s394_s4 = int_to_ptr.hbm [resolvable:$true] %s393_s4 }
  0x1e   :  { %372 = vmatpush.bf16.msra.mxu3 %v538_v27 }
  0x1f   :  { %288 = vmatpush.bf16.msra.mxu2 %v529_v12 }
  0x21   :  { %202 = vmatpush.bf16.msra.mxu1 %v520_v5 }
  0x22   :  { %373 = vmatpush.bf16.msra.mxu3 %v537_v28 }
  0x23   :  { %289 = vmatpush.bf16.msra.mxu2 %v528_v13 }
  0x25   :  { %203 = vmatpush.bf16.msra.mxu1 %v519_v6 }
  0x26   :  { %374 = vmatpush.bf16.msra.mxu3 %v536_v29 }
  0x27   :  { %290 = vmatpush.bf16.msra.mxu2 %v527_v22 }
  0x29   :  { %204 = vmatpush.bf16.msra.mxu1 %v518_v7 }
  0x2a   :  { %375 = vmatpush.bf16.msra.mxu3 %v535_v38 }
  0x2b   :  { %291 = vmatpush.bf16.msra.mxu2 %v526_v23 }
  0x2d   :  { %205 = vmatpush.bf16.msra.mxu1 %v517_v8 }
  0x2e   :  { %376 = vmatpush.bf16.msra.mxu3 %v534_v39 }
  0x2f   :  { %292 = vmatpush.bf16.msra.mxu2 %v525_v24 }
  0x31   :  { %206 = vmatpush.bf16.msra.mxu1 %v516_v9 }
  0x32   :  { %377 = vmatpush.bf16.msra.mxu3 %v533_v40 }
  0x33   :  { %293 = vmatpush.bf16.msra.mxu2 %v524_v25 }
  0x36   :  { %378 = vmatpush.bf16.msra.mxu3 %v532_v41 }
  0x94   :  { %v123_v14 = vpop.f32.mrf.mxu0 }
  0x95   :  { %v124_v16 = vadd.f32 %v549_v15, %v123_v14 }
  0x97   :  { %v128_v19 = vmax.f32 %v124_v16, 0.0 }
  0x9c   :  { %v125_v17 = vpop.f32.mrf.mxu0 }
  0x9d   :  { %v126_v18 = vadd.f32 %v549_v15, %v125_v17 }
  0x9f   :  { %v129_v20 = vmax.f32 %v126_v18, 0.0 }
  0xa1   :  { %v130_v21 = vpack.c.bf16 %v129_v20, %v128_v19 }
  0xa3   :  { %207 = vmatmul.bf16.vlgmr.msra.gmra.mxu1 %v130_v21 }
 0x120   :  { %v208_v30 = vpop.f32.mrf.mxu1 }
 0x121   :  { %v209_v32 = vadd.f32 %v550_v31, %v208_v30 }
 0x123   :  { %v213_v35 = vmax.f32 %v209_v32, 0.0 }
 0x128   :  { %v210_v33 = vpop.f32.mrf.mxu1 }
 0x129   :  { %v211_v34 = vadd.f32 %v550_v31, %v210_v33 }
 0x12b   :  { %v214_v36 = vmax.f32 %v211_v34, 0.0 }
 0x12d   :  { %v215_v37 = vpack.c.bf16 %v214_v36, %v213_v35 }
 0x12f   :  { %294 = vmatmul.bf16.vlgmr.msra.gmra.mxu2 %v215_v37 }
 0x1b2   :  { %v295_v42 = vpop.f32.mrf.mxu2 }
 0x1b3   :  { %v296_v44 = vadd.f32 %v551_v43, %v295_v42 }
 0x1b5   :  { %v300_v47 = vmax.f32 %v296_v44, 0.0 }
 0x1ba   :  { %v297_v45 = vpop.f32.mrf.mxu2 }
 0x1bb   :  { %v298_v46 = vadd.f32 %v551_v43, %v297_v45 }
 0x1bd   :  { %v301_v48 = vmax.f32 %v298_v46, 0.0 }
 0x1bf   :  { %v302_v49 = vpack.c.bf16 %v301_v48, %v300_v47 }
 0x1c1   :  { %379 = vmatmul.bf16.vlgmr.msra.gmra.mxu3 %v302_v49 }
 0x244   :  { %v380_v51 = vpop.f32.mrf.mxu3 }
 0x245   :  { %v381_v52 = vadd.f32 %v552_v50, %v380_v51 }
 0x247   :  { %385 = vst [vmem:[#allocation10] sm:$0xff] %v381_v52 }
 0x24c   :  { %v382_v53 = vpop.f32.mrf.mxu3 }
 0x24d   :  { %v383_v54 = vadd.f32 %v552_v50, %v382_v53 }
 0x24f   :  { %386 = vst [vmem:[#allocation10 + $0x8] sm:$0xff] %v383_v54 }
 0x250   :  { %399 = dma.vmem_to_hbm [thread:$0]  %s392_s27, 256, %s394_s4, [#allocation4], %s688_s30, %s688_s30, %s689_s8  }
 0x251   :  { %679 = dma.done.wait [#allocation4], 256  }
 0x252   :  { %680 = vsyncadd [#allocation4], 4294967040 }
 0x253   :  { %404 = vsyncpa [#allocation3], 1 }
 0x254   :  { %405 = vsyncpa [#allocation6], 1 }
 0x255   :  { %406 = vsyncpa [#allocation9], 1 }
 0x256   :  { %407 = vsyncpa [#allocation4], 1 }

</bundles_post_ra>
